<compile_context>
chip_gen: v5e
topology: v5e:2x2
jax: 0.10.0
libtpu: 0.0.40
codegen_flags: <defaults>
</compile_context>

<pallas_src>
import functools

import jax
import jax.numpy as jnp
import numpy as np
from jax.experimental import pallas as pl
from jax.experimental.pallas import tpu as pltpu


# ---------------------------- fused Pallas kernel ----------------------------

def _down_fused_kernel(x_ref, w1_ref, b1_ref, w2_ref, b2_ref, o_ref,
                       pad1_ref, pad2_ref, *, NB, Ho, Wo, Cin, Cmid, Cout):
    # x_ref : (NB, 4, Ho, Wo*Cin)  bf16 pool candidates (2x2 pairs pre-deinterleaved)
    # w1_ref: (3, Wo*Cin,  Wo*Cmid) bf16 block-Toeplitz conv1 weights (BN1 scale folded)
    # b1_ref: (1, Wo*Cmid)          f32  BN1 shift, tiled across Wo
    # w2_ref: (3, Wo*Cmid, Wo*Cout) bf16 block-Toeplitz conv2 weights (BN2 scale folded)
    # b2_ref: (1, Wo*Cout)          f32  BN2 shift, tiled across Wo
    # o_ref : (NB, Ho, Wo*Cout)     f32
    # pad1_ref / pad2_ref: bf16 VMEM scratch (NB*(Ho+2), Wo*C): NB vertically
    #   padded images stacked along the sublane axis (2 zero halo rows each).
    RS = Ho + 2                  # padded rows per image in the stacked scratch
    M = NB * RS - 2              # matmul M dimension: one slab over all NB images

    # ---- MaxPool2d(2): 3 aligned VPU maxes per image (deinterleave done in wrapper),
    #      then write interiors + (re)zero the two halo rows of each image.
    #      Zeroing only halos (not the whole scratch) every step is cheap and is
    #      megacore-safe (each TensorCore has its own scratch, so a
    #      @pl.when(program_id==0) one-time init would be wrong on v7x).
    z1 = jnp.zeros((1, Wo * Cin), pad1_ref.dtype)
    for i in range(NB):
        p01 = jnp.maximum(x_ref[i, 0], x_ref[i, 1])
        p23 = jnp.maximum(x_ref[i, 2], x_ref[i, 3])
        pad1_ref[i * RS + 1:i * RS + 1 + Ho, :] = jnp.maximum(p01, p23)
        pad1_ref[i * RS:i * RS + 1, :] = z1
        pad1_ref[i * RS + Ho + 1:i * RS + Ho + 2, :] = z1

    # ---- Conv1 (3x3, pad=1, no bias) + BN1 + ReLU: 3 block-Toeplitz MXU matmuls
    #      over the whole image stack (bf16 operands, f32 accumulation). ----
    acc1 = jnp.zeros((M, Wo * Cmid), jnp.float32)
    for dy in range(3):
        acc1 = acc1 + jnp.dot(pad1_ref[dy:dy + M, :], w1_ref[dy],
                              preferred_element_type=jnp.float32)
    h1 = jnp.maximum(acc1 + b1_ref[...], 0.0).astype(pad2_ref.dtype)

    # ---- Stage conv2 input: one bulk store (row m of h1 is padded row m+1 of the
    #      stack); the garbage rows between images land exactly on halo rows,
    #      which are re-zeroed right after. ----
    pad2_ref[1:1 + M, :] = h1
    z2 = jnp.zeros((1, Wo * Cmid), pad2_ref.dtype)
    for i in range(NB):
        pad2_ref[i * RS:i * RS + 1, :] = z2
        pad2_ref[i * RS + Ho + 1:i * RS + Ho + 2, :] = z2

    # ---- Conv2 (3x3, pad=1, no bias) + BN2 + ReLU ----
    acc2 = jnp.zeros((M, Wo * Cout), jnp.float32)
    for dy in range(3):
        acc2 = acc2 + jnp.dot(pad2_ref[dy:dy + M, :], w2_ref[dy],
                              preferred_element_type=jnp.float32)
    out = jnp.maximum(acc2 + b2_ref[...], 0.0)
    for i in range(NB):              # drop the 2 garbage rows between images
        o_ref[i] = out[i * RS:i * RS + Ho]


# ------------------------------ wrapper ---------------------------------

def down_forward_pallas(prepped, x_nchw):
    w1t, b1t = prepped["w1t"], prepped["b1t"]
    w2t, b2t = prepped["w2t"], prepped["b2t"]
    N, Cin, H, W = x_nchw.shape
    assert H % 2 == 0 and W % 2 == 0, "MaxPool2d(2) path expects even H and W"
    Ho, Wo = H // 2, W // 2

    # Static shape checks: a prepped dict built for a different pooled width or
    # channel count must fail loudly instead of silently producing garbage.
    assert w1t.shape[0] == 3 and w2t.shape[0] == 3
    assert w1t.shape[1] == Wo * Cin, (w1t.shape, Wo, Cin)
    assert w1t.shape[2] % Wo == 0
    Cmid = w1t.shape[2] // Wo
    assert w2t.shape[1] == Wo * Cmid, (w2t.shape, Wo, Cmid)
    assert w2t.shape[2] % Wo == 0
    Cout = w2t.shape[2] // Wo
    assert b1t.shape == (1, Wo * Cmid) and b2t.shape == (1, Wo * Cout)

    # Split the batch into G parallel grid steps (G=2 keeps both v7x TensorCores
    # busy); the NB images of each step are folded into the matmul M dimension.
    G = 2 if (N >= 2 and N % 2 == 0) else 1
    NB = N // G

    # NCHW -> NHWC -> deinterleave both 2x2 pooling pairs at the boundary so the
    # in-kernel maxpool is pure aligned VPU max work; cast to bf16 (halves input
    # DMA; max() commutes with the monotonic bf16 rounding).
    x = jnp.transpose(x_nchw, (0, 2, 3, 1))                      # (N, H, W, Cin)
    x = x.reshape(N, Ho, 2, Wo, 2, Cin)
    x = jnp.transpose(x, (0, 2, 4, 1, 3, 5)).reshape(N, 4, Ho, Wo * Cin)
    x = x.astype(jnp.bfloat16)

    kernel = functools.partial(_down_fused_kernel, NB=NB, Ho=Ho, Wo=Wo,
                               Cin=Cin, Cmid=Cmid, Cout=Cout)
    out_flat = pl.pallas_call(
        kernel,
        out_shape=jax.ShapeDtypeStruct((N, Ho, Wo * Cout), jnp.float32),
        grid=(G,),
        in_specs=[
            pl.BlockSpec((NB, 4, Ho, Wo * Cin), lambda g: (g, 0, 0, 0)),
            pl.BlockSpec((3, Wo * Cin, Wo * Cmid), lambda g: (0, 0, 0)),
            pl.BlockSpec((1, Wo * Cmid), lambda g: (0, 0)),
            pl.BlockSpec((3, Wo * Cmid, Wo * Cout), lambda g: (0, 0, 0)),
            pl.BlockSpec((1, Wo * Cout), lambda g: (0, 0)),
        ],
        out_specs=pl.BlockSpec((NB, Ho, Wo * Cout), lambda g: (g, 0, 0)),
        scratch_shapes=[
            pltpu.VMEM((NB * (Ho + 2), Wo * Cin), jnp.bfloat16),
            pltpu.VMEM((NB * (Ho + 2), Wo * Cmid), jnp.bfloat16),
        ],
        compiler_params=pltpu.CompilerParams(
            dimension_semantics=("parallel",),
            vmem_limit_bytes=32 * 1024 * 1024),
    )(x, w1t, b1t, w2t, b2t)

    out = out_flat.reshape(N, Ho, Wo, Cout)
    return jnp.transpose(out, (0, 3, 1, 2))                      # NHWC -> NCHW


down_forward = jax.jit(down_forward_pallas)


# --------------------------- parameter setup ----------------------------

def init_down_params(key, in_channels, out_channels, mid_channels=None, eps=1e-5):
    """PyTorch-style parameters: conv weights (Cout, Cin, 3, 3), raw BN stats."""
    if mid_channels is None:
        mid_channels = out_channels
    k1, k2, k3, k4 = jax.random.split(key, 4)

    def conv_w(k, cin, cout):
        return 0.1 * jax.random.normal(k, (cout, cin, 3, 3), jnp.float32)

    def bn(k, c):
        ka, kb, kc, kd = jax.random.split(k, 4)
        return dict(
            gamma=1.0 + 0.1 * jax.random.normal(ka, (c,), jnp.float32),
            beta=0.1 * jax.random.normal(kb, (c,), jnp.float32),
            mean=0.1 * jax.random.normal(kc, (c,), jnp.float32),
            var=1.0 + 0.1 * jnp.abs(jax.random.normal(kd, (c,), jnp.float32)),
            eps=eps)

    return {"w1": conv_w(k1, in_channels, mid_channels), "bn1": bn(k2, mid_channels),
            "w2": conv_w(k3, mid_channels, out_channels), "bn2": bn(k4, out_channels)}


def _folded_bn(bn):
    scale = np.asarray(bn["gamma"], np.float32) / np.sqrt(
        np.asarray(bn["var"], np.float32) + bn["eps"])
    shift = np.asarray(bn["beta"], np.float32) - np.asarray(bn["mean"], np.float32) * scale
    return scale, shift


def _toeplitz_weights(w_oihw, scale, out_w):
    """(Cout,Cin,3,3) PyTorch weights + folded BN scale -> (3, out_w*Cin, out_w*Cout)
    block-Toeplitz matrices; horizontal zero-padding (pad=1) folded in by dropping
    out-of-range taps. Built host-side, once, at parameter-prep time."""
    w = np.asarray(w_oihw, np.float32)
    cout, cin, _, _ = w.shape
    w = np.transpose(w, (2, 3, 1, 0)) * scale          # (3,3,Cin,Cout), BN scale folded
    t = np.zeros((3, out_w * cin, out_w * cout), np.float32)
    for dy in range(3):
        for xo in range(out_w):
            for dx in range(3):
                xi = xo + dx - 1
                if 0 <= xi < out_w:
                    t[dy, xi * cin:(xi + 1) * cin, xo * cout:(xo + 1) * cout] = w[dy, dx]
    return jnp.asarray(t)


def prepare_down_params(params, pooled_width):
    """Fold BN (inference mode) into weights/shifts and build width-specialized
    block-Toeplitz matrices; weights stored as bf16 for the MXU's native path."""
    s1, b1 = _folded_bn(params["bn1"])
    s2, b2 = _folded_bn(params["bn2"])
    return {
        "w1t": _toeplitz_weights(params["w1"], s1, pooled_width).astype(jnp.bfloat16),
        "b1t": jnp.asarray(np.tile(b1, pooled_width)[None, :], jnp.float32),
        "w2t": _toeplitz_weights(params["w2"], s2, pooled_width).astype(jnp.bfloat16),
        "b2t": jnp.asarray(np.tile(b2, pooled_width)[None, :], jnp.float32),
    }


# --------------------------- pure-JAX reference --------------------------

def down_forward_ref(params, x_nchw):
    x = jnp.transpose(x_nchw, (0, 2, 3, 1))
    x = jax.lax.reduce_window(x, -jnp.inf, jax.lax.max,
                              (1, 2, 2, 1), (1, 2, 2, 1), "VALID")
    for w_key, bn_key in (("w1", "bn1"), ("w2", "bn2")):
        w = jnp.transpose(params[w_key], (2, 3, 1, 0))   # OIHW -> HWIO
        bn = params[bn_key]
        y = jax.lax.conv_general_dilated(
            x, w, (1, 1), "SAME",
            dimension_numbers=("NHWC", "HWIO", "NHWC"),
            precision=jax.lax.Precision.HIGHEST)
        scale = bn["gamma"] / jnp.sqrt(bn["var"] + bn["eps"])
        shift = bn["beta"] - bn["mean"] * scale
        x = jnp.maximum(y * scale + shift, 0.0)
    return jnp.transpose(x, (0, 3, 1, 2))


if __name__ == "__main__":
    key = jax.random.PRNGKey(0)
    kx, kp = jax.random.split(key)

    # Down(in_channels=4, out_channels=8); batch=4 so the kernel exercises both
    # the 2-way parallel grid (v7x megacore) and 2-image batching in matmul M.
    x = jax.random.normal(kx, (4, 4, 16, 16), jnp.float32)
    params = init_down_params(kp, in_channels=4, out_channels=8)
    prepped = prepare_down_params(params, pooled_width=x.shape[-1] // 2)

    out = jax.block_until_ready(down_forward(prepped, x))
    assert out.shape == (4, 8, 8, 8), out.shape

    ref = jax.block_until_ready(down_forward_ref(params, x))
    # bf16 MXU operands with f32 accumulation: tolerance loosened vs f32 reference.
    np.testing.assert_allclose(np.asarray(out), np.asarray(ref),
                               rtol=5e-2, atol=5e-2)
    print("KERNEL_OK")
</pallas_src>

<mosaic_0001>
module attributes {stable_mosaic.version = 11 : i64} {
  func.func @_down_fused_kernel(%arg0: i32, %arg1: memref<2x4x8x32xbf16, #tpu.memory_space<vmem>>, %arg2: memref<3x32x64xbf16, #tpu.memory_space<vmem>>, %arg3: memref<1x64xf32, #tpu.memory_space<vmem>>, %arg4: memref<3x64x64xbf16, #tpu.memory_space<vmem>>, %arg5: memref<1x64xf32, #tpu.memory_space<vmem>>, %arg6: memref<2x8x64xf32, #tpu.memory_space<vmem>>, %arg7: memref<20x32xbf16, #tpu.memory_space<vmem>>, %arg8: memref<20x64xbf16, #tpu.memory_space<vmem>>) attributes {dimension_semantics = [#tpu.dimension_semantics<parallel>], iteration_bounds = array<i64: 2>, scalar_prefetch = 0 : i64, scratch_operands = 2 : i64, tpu.core_type = #tpu.core_type<tc>, window_params = [{transform_indices = @transform_0, window_bounds = array<i64: 2, 4, 8, 32>}, {pipeline_mode = #tpu.pipeline_mode<synchronous>, transform_indices = @transform_1, window_bounds = array<i64: 3, 32, 64>}, {pipeline_mode = #tpu.pipeline_mode<synchronous>, transform_indices = @transform_2, window_bounds = array<i64: 1, 64>}, {pipeline_mode = #tpu.pipeline_mode<synchronous>, transform_indices = @transform_3, window_bounds = array<i64: 3, 64, 64>}, {pipeline_mode = #tpu.pipeline_mode<synchronous>, transform_indices = @transform_4, window_bounds = array<i64: 1, 64>}, {transform_indices = @transform_5, window_bounds = array<i64: 2, 8, 64>}]} {
    %cst = arith.constant 0.000000e+00 : bf16
    %0 = vector.broadcast %cst : bf16 to vector<1x32xbf16>
    %c0 = arith.constant 0 : index
    %c0_0 = arith.constant 0 : index
    %c0_1 = arith.constant 0 : index
    %c0_2 = arith.constant 0 : index
    %1 = vector.load %arg1[%c0, %c0_0, %c0_1, %c0_2] : memref<2x4x8x32xbf16, #tpu.memory_space<vmem>>, vector<1x1x8x32xbf16>
    %2 = vector.shape_cast %1 : vector<1x1x8x32xbf16> to vector<8x32xbf16>
    %c0_3 = arith.constant 0 : index
    %c1 = arith.constant 1 : index
    %c0_4 = arith.constant 0 : index
    %c0_5 = arith.constant 0 : index
    %3 = vector.load %arg1[%c0_3, %c1, %c0_4, %c0_5] : memref<2x4x8x32xbf16, #tpu.memory_space<vmem>>, vector<1x1x8x32xbf16>
    %4 = vector.shape_cast %3 : vector<1x1x8x32xbf16> to vector<8x32xbf16>
    %5 = arith.maximumf %2, %4 : vector<8x32xbf16>
    %c0_6 = arith.constant 0 : index
    %c2 = arith.constant 2 : index
    %c0_7 = arith.constant 0 : index
    %c0_8 = arith.constant 0 : index
    %6 = vector.load %arg1[%c0_6, %c2, %c0_7, %c0_8] : memref<2x4x8x32xbf16, #tpu.memory_space<vmem>>, vector<1x1x8x32xbf16>
    %7 = vector.shape_cast %6 : vector<1x1x8x32xbf16> to vector<8x32xbf16>
    %c0_9 = arith.constant 0 : index
    %c3 = arith.constant 3 : index
    %c0_10 = arith.constant 0 : index
    %c0_11 = arith.constant 0 : index
    %8 = vector.load %arg1[%c0_9, %c3, %c0_10, %c0_11] : memref<2x4x8x32xbf16, #tpu.memory_space<vmem>>, vector<1x1x8x32xbf16>
    %9 = vector.shape_cast %8 : vector<1x1x8x32xbf16> to vector<8x32xbf16>
    %10 = arith.maximumf %7, %9 : vector<8x32xbf16>
    %11 = arith.maximumf %5, %10 : vector<8x32xbf16>
    %c1_12 = arith.constant 1 : index
    %c0_13 = arith.constant 0 : index
    %12 = vector.load %arg7[%c1_12, %c0_13] : memref<20x32xbf16, #tpu.memory_space<vmem>>, vector<8x32xbf16>
    tpu.vector_store %arg7[%c1_12, %c0_13], %11 {strides = array<i32>} : memref<20x32xbf16, #tpu.memory_space<vmem>>, vector<8x32xbf16>,
    %c0_14 = arith.constant 0 : index
    %c0_15 = arith.constant 0 : index
    %13 = vector.load %arg7[%c0_14, %c0_15] : memref<20x32xbf16, #tpu.memory_space<vmem>>, vector<1x32xbf16>
    tpu.vector_store %arg7[%c0_14, %c0_15], %0 {strides = array<i32>} : memref<20x32xbf16, #tpu.memory_space<vmem>>, vector<1x32xbf16>,
    %c9 = arith.constant 9 : index
    %c0_16 = arith.constant 0 : index
    %14 = vector.load %arg7[%c9, %c0_16] : memref<20x32xbf16, #tpu.memory_space<vmem>>, vector<1x32xbf16>
    tpu.vector_store %arg7[%c9, %c0_16], %0 {strides = array<i32>} : memref<20x32xbf16, #tpu.memory_space<vmem>>, vector<1x32xbf16>,
    %c1_17 = arith.constant 1 : index
    %c0_18 = arith.constant 0 : index
    %c0_19 = arith.constant 0 : index
    %c0_20 = arith.constant 0 : index
    %15 = vector.load %arg1[%c1_17, %c0_18, %c0_19, %c0_20] : memref<2x4x8x32xbf16, #tpu.memory_space<vmem>>, vector<1x1x8x32xbf16>
    %16 = vector.shape_cast %15 : vector<1x1x8x32xbf16> to vector<8x32xbf16>
    %c1_21 = arith.constant 1 : index
    %c1_22 = arith.constant 1 : index
    %c0_23 = arith.constant 0 : index
    %c0_24 = arith.constant 0 : index
    %17 = vector.load %arg1[%c1_21, %c1_22, %c0_23, %c0_24] : memref<2x4x8x32xbf16, #tpu.memory_space<vmem>>, vector<1x1x8x32xbf16>
    %18 = vector.shape_cast %17 : vector<1x1x8x32xbf16> to vector<8x32xbf16>
    %19 = arith.maximumf %16, %18 : vector<8x32xbf16>
    %c1_25 = arith.constant 1 : index
    %c2_26 = arith.constant 2 : index
    %c0_27 = arith.constant 0 : index
    %c0_28 = arith.constant 0 : index
    %20 = vector.load %arg1[%c1_25, %c2_26, %c0_27, %c0_28] : memref<2x4x8x32xbf16, #tpu.memory_space<vmem>>, vector<1x1x8x32xbf16>
    %21 = vector.shape_cast %20 : vector<1x1x8x32xbf16> to vector<8x32xbf16>
    %c1_29 = arith.constant 1 : index
    %c3_30 = arith.constant 3 : index
    %c0_31 = arith.constant 0 : index
    %c0_32 = arith.constant 0 : index
    %22 = vector.load %arg1[%c1_29, %c3_30, %c0_31, %c0_32] : memref<2x4x8x32xbf16, #tpu.memory_space<vmem>>, vector<1x1x8x32xbf16>
    %23 = vector.shape_cast %22 : vector<1x1x8x32xbf16> to vector<8x32xbf16>
    %24 = arith.maximumf %21, %23 : vector<8x32xbf16>
    %25 = arith.maximumf %19, %24 : vector<8x32xbf16>
    %c11 = arith.constant 11 : index
    %c0_33 = arith.constant 0 : index
    %26 = vector.load %arg7[%c11, %c0_33] : memref<20x32xbf16, #tpu.memory_space<vmem>>, vector<8x32xbf16>
    tpu.vector_store %arg7[%c11, %c0_33], %25 {strides = array<i32>} : memref<20x32xbf16, #tpu.memory_space<vmem>>, vector<8x32xbf16>,
    %c10 = arith.constant 10 : index
    %c0_34 = arith.constant 0 : index
    %27 = vector.load %arg7[%c10, %c0_34] : memref<20x32xbf16, #tpu.memory_space<vmem>>, vector<1x32xbf16>
    tpu.vector_store %arg7[%c10, %c0_34], %0 {strides = array<i32>} : memref<20x32xbf16, #tpu.memory_space<vmem>>, vector<1x32xbf16>,
    %c19 = arith.constant 19 : index
    %c0_35 = arith.constant 0 : index
    %28 = vector.load %arg7[%c19, %c0_35] : memref<20x32xbf16, #tpu.memory_space<vmem>>, vector<1x32xbf16>
    tpu.vector_store %arg7[%c19, %c0_35], %0 {strides = array<i32>} : memref<20x32xbf16, #tpu.memory_space<vmem>>, vector<1x32xbf16>,
    %cst_36 = arith.constant 0.000000e+00 : f32
    %29 = vector.broadcast %cst_36 : f32 to vector<18x64xf32>
    %c0_37 = arith.constant 0 : index
    %c0_38 = arith.constant 0 : index
    %30 = vector.load %arg7[%c0_37, %c0_38] : memref<20x32xbf16, #tpu.memory_space<vmem>>, vector<18x32xbf16>
    %c0_39 = arith.constant 0 : index
    %c0_40 = arith.constant 0 : index
    %c0_41 = arith.constant 0 : index
    %31 = vector.load %arg2[%c0_39, %c0_40, %c0_41] : memref<3x32x64xbf16, #tpu.memory_space<vmem>>, vector<1x32x64xbf16>
    %32 = vector.shape_cast %31 : vector<1x32x64xbf16> to vector<32x64xbf16>
    %cst_42 = arith.constant dense<0.000000e+00> : vector<18x64xf32>
    %33 = tpu.matmul %30, %32, %cst_42 {dimension_numbers = #tpu.dot_dimension_numbers<[1], [0], [0], [1], [0, 0, 1, 1], [], []>} : vector<18x32xbf16>, vector<32x64xbf16>, vector<18x64xf32> -> vector<18x64xf32>
    %34 = arith.addf %29, %33 : vector<18x64xf32>
    %c1_43 = arith.constant 1 : index
    %c0_44 = arith.constant 0 : index
    %35 = vector.load %arg7[%c1_43, %c0_44] : memref<20x32xbf16, #tpu.memory_space<vmem>>, vector<18x32xbf16>
    %c1_45 = arith.constant 1 : index
    %c0_46 = arith.constant 0 : index
    %c0_47 = arith.constant 0 : index
    %36 = vector.load %arg2[%c1_45, %c0_46, %c0_47] : memref<3x32x64xbf16, #tpu.memory_space<vmem>>, vector<1x32x64xbf16>
    %37 = vector.shape_cast %36 : vector<1x32x64xbf16> to vector<32x64xbf16>
    %cst_48 = arith.constant dense<0.000000e+00> : vector<18x64xf32>
    %38 = tpu.matmul %35, %37, %cst_48 {dimension_numbers = #tpu.dot_dimension_numbers<[1], [0], [0], [1], [0, 0, 1, 1], [], []>} : vector<18x32xbf16>, vector<32x64xbf16>, vector<18x64xf32> -> vector<18x64xf32>
    %39 = arith.addf %34, %38 : vector<18x64xf32>
    %c2_49 = arith.constant 2 : index
    %c0_50 = arith.constant 0 : index
    %40 = vector.load %arg7[%c2_49, %c0_50] : memref<20x32xbf16, #tpu.memory_space<vmem>>, vector<18x32xbf16>
    %c2_51 = arith.constant 2 : index
    %c0_52 = arith.constant 0 : index
    %c0_53 = arith.constant 0 : index
    %41 = vector.load %arg2[%c2_51, %c0_52, %c0_53] : memref<3x32x64xbf16, #tpu.memory_space<vmem>>, vector<1x32x64xbf16>
    %42 = vector.shape_cast %41 : vector<1x32x64xbf16> to vector<32x64xbf16>
    %cst_54 = arith.constant dense<0.000000e+00> : vector<18x64xf32>
    %43 = tpu.matmul %40, %42, %cst_54 {dimension_numbers = #tpu.dot_dimension_numbers<[1], [0], [0], [1], [0, 0, 1, 1], [], []>} : vector<18x32xbf16>, vector<32x64xbf16>, vector<18x64xf32> -> vector<18x64xf32>
    %44 = arith.addf %39, %43 : vector<18x64xf32>
    %c0_55 = arith.constant 0 : index
    %c0_56 = arith.constant 0 : index
    %45 = vector.load %arg3[%c0_55, %c0_56] : memref<1x64xf32, #tpu.memory_space<vmem>>, vector<1x64xf32>
    %46 = vector.broadcast %45 : vector<1x64xf32> to vector<18x64xf32>
    %47 = arith.addf %44, %46 : vector<18x64xf32>
    %cst_57 = arith.constant 0.000000e+00 : f32
    %48 = vector.broadcast %cst_57 : f32 to vector<18x64xf32>
    %49 = arith.maximumf %47, %48 : vector<18x64xf32>
    %50 = arith.truncf %49 : vector<18x64xf32> to vector<18x64xbf16>
    %c1_58 = arith.constant 1 : index
    %c0_59 = arith.constant 0 : index
    %51 = vector.load %arg8[%c1_58, %c0_59] : memref<20x64xbf16, #tpu.memory_space<vmem>>, vector<18x64xbf16>
    tpu.vector_store %arg8[%c1_58, %c0_59], %50 {strides = array<i32>} : memref<20x64xbf16, #tpu.memory_space<vmem>>, vector<18x64xbf16>,
    %cst_60 = arith.constant 0.000000e+00 : bf16
    %52 = vector.broadcast %cst_60 : bf16 to vector<1x64xbf16>
    %c0_61 = arith.constant 0 : index
    %c0_62 = arith.constant 0 : index
    %53 = vector.load %arg8[%c0_61, %c0_62] : memref<20x64xbf16, #tpu.memory_space<vmem>>, vector<1x64xbf16>
    tpu.vector_store %arg8[%c0_61, %c0_62], %52 {strides = array<i32>} : memref<20x64xbf16, #tpu.memory_space<vmem>>, vector<1x64xbf16>,
    %c9_63 = arith.constant 9 : index
    %c0_64 = arith.constant 0 : index
    %54 = vector.load %arg8[%c9_63, %c0_64] : memref<20x64xbf16, #tpu.memory_space<vmem>>, vector<1x64xbf16>
    tpu.vector_store %arg8[%c9_63, %c0_64], %52 {strides = array<i32>} : memref<20x64xbf16, #tpu.memory_space<vmem>>, vector<1x64xbf16>,
    %c10_65 = arith.constant 10 : index
    %c0_66 = arith.constant 0 : index
    %55 = vector.load %arg8[%c10_65, %c0_66] : memref<20x64xbf16, #tpu.memory_space<vmem>>, vector<1x64xbf16>
    tpu.vector_store %arg8[%c10_65, %c0_66], %52 {strides = array<i32>} : memref<20x64xbf16, #tpu.memory_space<vmem>>, vector<1x64xbf16>,
    %c19_67 = arith.constant 19 : index
    %c0_68 = arith.constant 0 : index
    %56 = vector.load %arg8[%c19_67, %c0_68] : memref<20x64xbf16, #tpu.memory_space<vmem>>, vector<1x64xbf16>
    tpu.vector_store %arg8[%c19_67, %c0_68], %52 {strides = array<i32>} : memref<20x64xbf16, #tpu.memory_space<vmem>>, vector<1x64xbf16>,
    %cst_69 = arith.constant 0.000000e+00 : f32
    %57 = vector.broadcast %cst_69 : f32 to vector<18x64xf32>
    %c0_70 = arith.constant 0 : index
    %c0_71 = arith.constant 0 : index
    %58 = vector.load %arg8[%c0_70, %c0_71] : memref<20x64xbf16, #tpu.memory_space<vmem>>, vector<18x64xbf16>
    %c0_72 = arith.constant 0 : index
    %c0_73 = arith.constant 0 : index
    %c0_74 = arith.constant 0 : index
    %59 = vector.load %arg4[%c0_72, %c0_73, %c0_74] : memref<3x64x64xbf16, #tpu.memory_space<vmem>>, vector<1x64x64xbf16>
    %60 = vector.shape_cast %59 : vector<1x64x64xbf16> to vector<64x64xbf16>
    %cst_75 = arith.constant dense<0.000000e+00> : vector<18x64xf32>
    %61 = tpu.matmul %58, %60, %cst_75 {dimension_numbers = #tpu.dot_dimension_numbers<[1], [0], [0], [1], [0, 0, 1, 1], [], []>} : vector<18x64xbf16>, vector<64x64xbf16>, vector<18x64xf32> -> vector<18x64xf32>
    %62 = arith.addf %57, %61 : vector<18x64xf32>
    %c1_76 = arith.constant 1 : index
    %c0_77 = arith.constant 0 : index
    %63 = vector.load %arg8[%c1_76, %c0_77] : memref<20x64xbf16, #tpu.memory_space<vmem>>, vector<18x64xbf16>
    %c1_78 = arith.constant 1 : index
    %c0_79 = arith.constant 0 : index
    %c0_80 = arith.constant 0 : index
    %64 = vector.load %arg4[%c1_78, %c0_79, %c0_80] : memref<3x64x64xbf16, #tpu.memory_space<vmem>>, vector<1x64x64xbf16>
    %65 = vector.shape_cast %64 : vector<1x64x64xbf16> to vector<64x64xbf16>
    %cst_81 = arith.constant dense<0.000000e+00> : vector<18x64xf32>
    %66 = tpu.matmul %63, %65, %cst_81 {dimension_numbers = #tpu.dot_dimension_numbers<[1], [0], [0], [1], [0, 0, 1, 1], [], []>} : vector<18x64xbf16>, vector<64x64xbf16>, vector<18x64xf32> -> vector<18x64xf32>
    %67 = arith.addf %62, %66 : vector<18x64xf32>
    %c2_82 = arith.constant 2 : index
    %c0_83 = arith.constant 0 : index
    %68 = vector.load %arg8[%c2_82, %c0_83] : memref<20x64xbf16, #tpu.memory_space<vmem>>, vector<18x64xbf16>
    %c2_84 = arith.constant 2 : index
    %c0_85 = arith.constant 0 : index
    %c0_86 = arith.constant 0 : index
    %69 = vector.load %arg4[%c2_84, %c0_85, %c0_86] : memref<3x64x64xbf16, #tpu.memory_space<vmem>>, vector<1x64x64xbf16>
    %70 = vector.shape_cast %69 : vector<1x64x64xbf16> to vector<64x64xbf16>
    %cst_87 = arith.constant dense<0.000000e+00> : vector<18x64xf32>
    %71 = tpu.matmul %68, %70, %cst_87 {dimension_numbers = #tpu.dot_dimension_numbers<[1], [0], [0], [1], [0, 0, 1, 1], [], []>} : vector<18x64xbf16>, vector<64x64xbf16>, vector<18x64xf32> -> vector<18x64xf32>
    %72 = arith.addf %67, %71 : vector<18x64xf32>
    %c0_88 = arith.constant 0 : index
    %c0_89 = arith.constant 0 : index
    %73 = vector.load %arg5[%c0_88, %c0_89] : memref<1x64xf32, #tpu.memory_space<vmem>>, vector<1x64xf32>
    %74 = vector.broadcast %73 : vector<1x64xf32> to vector<18x64xf32>
    %75 = arith.addf %72, %74 : vector<18x64xf32>
    %cst_90 = arith.constant 0.000000e+00 : f32
    %76 = vector.broadcast %cst_90 : f32 to vector<18x64xf32>
    %77 = arith.maximumf %75, %76 : vector<18x64xf32>
    %78 = vector.extract_strided_slice %77 {offsets = [0, 0], sizes = [8, 64], strides = [1, 1]} : vector<18x64xf32> to vector<8x64xf32>
    %c0_91 = arith.constant 0 : index
    %c0_92 = arith.constant 0 : index
    %c0_93 = arith.constant 0 : index
    %79 = vector.load %arg6[%c0_91, %c0_92, %c0_93] : memref<2x8x64xf32, #tpu.memory_space<vmem>>, vector<1x8x64xf32>
    %80 = vector.shape_cast %79 : vector<1x8x64xf32> to vector<8x64xf32>
    %81 = vector.shape_cast %78 : vector<8x64xf32> to vector<1x8x64xf32>
    tpu.vector_store %arg6[%c0_91, %c0_92, %c0_93], %81 {strides = array<i32>} : memref<2x8x64xf32, #tpu.memory_space<vmem>>, vector<1x8x64xf32>,
    %82 = vector.extract_strided_slice %77 {offsets = [10, 0], sizes = [8, 64], strides = [1, 1]} : vector<18x64xf32> to vector<8x64xf32>
    %c1_94 = arith.constant 1 : index
    %c0_95 = arith.constant 0 : index
    %c0_96 = arith.constant 0 : index
    %83 = vector.load %arg6[%c1_94, %c0_95, %c0_96] : memref<2x8x64xf32, #tpu.memory_space<vmem>>, vector<1x8x64xf32>
    %84 = vector.shape_cast %83 : vector<1x8x64xf32> to vector<8x64xf32>
    %85 = vector.shape_cast %82 : vector<8x64xf32> to vector<1x8x64xf32>
    tpu.vector_store %arg6[%c1_94, %c0_95, %c0_96], %85 {strides = array<i32>} : memref<2x8x64xf32, #tpu.memory_space<vmem>>, vector<1x8x64xf32>,
    return
  }
  func.func @transform_0(%arg0: i32) -> (i32, i32, i32, i32) {
    %c0_i32 = arith.constant 0 : i32
    %c0_i32_0 = arith.constant 0 : i32
    %c0_i32_1 = arith.constant 0 : i32
    %c0_i32_2 = arith.constant 0 : i32
    return %arg0, %c0_i32, %c0_i32_0, %c0_i32_1 : i32, i32, i32, i32
  }
  func.func @transform_1(%arg0: i32) -> (i32, i32, i32) {
    %c0_i32 = arith.constant 0 : i32
    %c0_i32_0 = arith.constant 0 : i32
    %c0_i32_1 = arith.constant 0 : i32
    %c0_i32_2 = arith.constant 0 : i32
    return %c0_i32, %c0_i32_0, %c0_i32_1 : i32, i32, i32
  }
  func.func @transform_2(%arg0: i32) -> (i32, i32) {
    %c0_i32 = arith.constant 0 : i32
    %c0_i32_0 = arith.constant 0 : i32
    %c0_i32_1 = arith.constant 0 : i32
    return %c0_i32, %c0_i32_0 : i32, i32
  }
  func.func @transform_3(%arg0: i32) -> (i32, i32, i32) {
    %c0_i32 = arith.constant 0 : i32
    %c0_i32_0 = arith.constant 0 : i32
    %c0_i32_1 = arith.constant 0 : i32
    %c0_i32_2 = arith.constant 0 : i32
    return %c0_i32, %c0_i32_0, %c0_i32_1 : i32, i32, i32
  }
  func.func @transform_4(%arg0: i32) -> (i32, i32) {
    %c0_i32 = arith.constant 0 : i32
    %c0_i32_0 = arith.constant 0 : i32
    %c0_i32_1 = arith.constant 0 : i32
    return %c0_i32, %c0_i32_0 : i32, i32
  }
  func.func @transform_5(%arg0: i32) -> (i32, i32, i32) {
    %c0_i32 = arith.constant 0 : i32
    %c0_i32_0 = arith.constant 0 : i32
    %c0_i32_1 = arith.constant 0 : i32
    return %arg0, %c0_i32, %c0_i32_0 : i32, i32, i32
  }
}

</mosaic_0001>

<bundles_post_ra>
// kernel: down_forward_pallas.1
= control target key start
LH: loop header
LB: loop body
LE: loop exit
PB: predicated region body
PF: predicated region fallthrough
CT: control target
= control target key end

     0   :  { %s1084_s18 = smov 0   ;;  %s1228_s0 = inlined_call_operand.vmem [shape: bf16[4,4,8,32], index: 0, kind: input, shape index: {}]   ;;  %s1229_s1 = inlined_call_operand.vmem [shape: bf16[3,32,64], index: 1, kind: input, shape index: {}]   ;;  %s1230_s2 = inlined_call_operand.vmem [shape: f32[1,64], index: 2, kind: input, shape index: {}]   ;;  %s1231_s3 = inlined_call_operand.vmem [shape: bf16[3,64,64], index: 3, kind: input, shape index: {}]   ;;  %s1232_s4 = inlined_call_operand.vmem [shape: f32[1,64], index: 4, kind: input, shape index: {}]   ;;  %s1233_s5 = inlined_call_operand.vmem [shape: f32[4,8,64], index: 5, kind: output, shape index: {}]  }
   0x1 LB: > { %s851_s19 = sadd.s32 4294967295, %s1052_s18   ;;  %p855_p0 = scmp.ge.s32.totalorder %s1052_s18, 1  ;;  %s1052_s18 = sphi %s1084_s18, %s15_s18  }
   0x2   : > { %p189_p1 = scmp.lt.s32.totalorder %s1052_s18, 3 }
   0x4   : > { %p190_p2 = pnand %p855_p0, %p189_p1 }
   0x5   : > { %s856_s24 = sshll.u32 (!%p190_p2), %s851_s19, 1 }
   0x6   : > { %193 = sbr.rel (%p190_p2) target bundleno = 424 (0x1a8), region = 40  ;;  %p219_p3 = scmp.lt.s32.totalorder (!%p190_p2), %s856_s24, 3 }
   0xb   : > { %v984_v0 = vld [vmem:[%s1229_s1 + $0x18] sm:$0xff]  ;;  %v982_v1 = vld [vmem:[%s1229_s1 + $0x8] sm:$0xff]  ;;  %v983_v2 = vld [vmem:[%s1229_s1 + $0x10] sm:$0xff]  ;;  %s1241_s24 = smov (!%p219_p3, %s856_s24), 3  ;;  %vm267_vm0 = vcmask 253952   ;;  %vm311_vm3 = vcmask 257025  }
   0xc   : > { %1032 = vmatpush.bf16.msra.mxu2 %v984_v0  ;;  %1034 = vmatpush.bf16.msra.mxu3 %v982_v1  ;;  %v981_v3 = vld [vmem:[%s1229_s1] sm:$0xff]  ;;  %s980_s29 = sshll.u32 %s1241_s24, 4  ;;  %vm268_vm1 = vsmask.f32 256  ;;  %vm312_vm2 = vsmask.f32 7942 }
   0xd   : > { %394 = vmatpush.bf16.msra.mxu0 %v984_v0  ;;  %432 = vmatpush.bf16.msra.mxu1 %v982_v1  ;;  %s223_s7 = scalar_lea.vmem %s1228_s0, %s980_s29  ;;  %vm261_vm4 = vcmask 257024   ;;  %vm262_vm5 = vsmask.f32 7938  ;;  %vm317_vm6 = vcmask 254976   ;;  %vm318_vm7 = vsmask.f32 1280  ;;  %vm1112_vm8 = vmand %vm267_vm0, %vm268_vm1 }
   0xe   : > { %v1024_v4 = vld [vmem:[%s223_s7 + $0x10] sm:$0xff]   ;;  %v1025_v5 = vld [vmem:[%s223_s7 + $0x18] sm:$0xff]   ;;  %v1000_v6 = vld [vmem:[%s223_s7] sm:$0xff]   ;;  %vm323_vm12 = vcmask 254977   ;;  %s860_s17 = sshll.u32 %s1241_s24, 3 }
   0xf   : > { %v1009_v7 = vunpack.c.l.bf16 %v1024_v4  ;;  %v1010_v8 = vunpack.c.h.bf16 %v1024_v4  ;;  %v1013_v9 = vunpack.c.l.bf16 %v1025_v5  ;;  %v1014_v10 = vunpack.c.h.bf16 %v1025_v5  ;;  %v1023_v11 = vld [vmem:[%s223_s7 + $0x8] sm:$0xff]   ;;  %v270_v32 = vld [vmem:[#allocation2 + $0x4] sm:$0x1]  ;;  %vm1117_vm9 = vmand %vm311_vm3, %vm312_vm2  ;;  %s229_s21 = scalar_lea.vmem %s1233_s5, %s860_s17 }
  0x10   : > { %1033 = vmatpush.bf16.msra.mxu2 %v983_v2  ;;  %1035 = vmatpush.bf16.msra.mxu3 %v981_v3  ;;  %v1001_v12 = vunpack.c.l.bf16 %v1000_v6  ;;  %v1002_v13 = vunpack.c.h.bf16 %v1000_v6  ;;  %v1005_v14 = vunpack.c.l.bf16 %v1023_v11  ;;  %v1006_v15 = vunpack.c.h.bf16 %v1023_v11  ;;  %v314_v34 = vld [vmem:[#allocation2 + $0x4] sm:$0xe]  ;;  %v986_v36 = vld [vmem:[%s1229_s1 + $0x28] sm:$0xff]  ;;  %vm263_vm10 = vmand %vm261_vm4, %vm262_vm5 }
  0x11   : > { %395 = vmatpush.bf16.msra.mxu0 %v983_v2  ;;  %433 = vmatpush.bf16.msra.mxu1 %v981_v3  ;;  %v286_v16 = vmax.f32 %v1009_v7, %v1010_v8  ;;  %v294_v17 = vmax.f32 %v1013_v9, %v1014_v10  ;;  %v264_v37 = vld [vmem:[#allocation2] sm:$0xf]  ;;  %vm319_vm11 = vmand %vm317_vm6, %vm318_vm7  ;;  %v320_v38 = vld [vmem:[#allocation2 + $0x8] sm:$0x3]  ;;  %vm381_vm3 = vcmask 261120   ;;  %vm453_vm4 = vcmask 1046528  }
  0x12   : > { %v237_v18 = vmax.f32 %v1001_v12, %v1002_v13  ;;  %v245_v19 = vmax.f32 %v1005_v14, %v1006_v15  ;;  %v985_v42 = vld [vmem:[%s1229_s1 + $0x20] sm:$0xff]  ;;  %vm324_vm13 = vmand %vm323_vm12, %vm318_vm7  ;;  %vm539_vm6 = vcmask 519168  }
  0x13   : > { %v298_v20 = vmax.f32 %v286_v16, %v294_v17  ;;  %vm328_vm14 = vmand %vm323_vm12, %vm312_vm2 }
  0x14   : > { %v249_v21 = vmax.f32 %v237_v18, %v245_v19  ;;  %481 = vmatpush.bf16.msrb.mxu2 %v986_v36  ;;  %vm276_vm15 = vmand %vm267_vm0, %vm262_vm5  ;;  %vm353_vm0 = vsmask.f32 7424  ;;  %v990_v19 = vld [vmem:[%s1231_s3 + $0x18] sm:$0xff] }
  0x15   : > { %v299_v22 = vpack.c.bf16 %v298_v20, %v298_v20  ;;  %698 = vmatpush.bf16.msrb.mxu0 %v990_v19  ;;  %v998_v36 = vld [vmem:[%s1231_s3 + $0x58] sm:$0xff] }
  0x16   : > { %v250_v23 = vpack.c.bf16 %v249_v21, %v249_v21  ;;  %v989_v21 = vld [vmem:[%s1231_s3 + $0x10] sm:$0xff]  ;;  %762 = vmatpush.bf16.msrb.mxu1 %v998_v36 }
  0x17   : > { %v301_v24 = vshrl.u32 %v299_v22, 16  ;;  %v304_v25 = vshll.u32 %v299_v22, 16  ;;  %v1044_v22 = vld [vmem:[%s1230_s2] ss:$0 sm:$0xff] }
  0x18   : > { %v252_v26 = vshrl.u32 %v250_v23, 16  ;;  %v255_v27 = vshll.u32 %v250_v23, 16  ;;  %482 = vmatpush.bf16.msrb.mxu2 %v985_v42 }
  0x19   : > { %v303_v28 = vrot.slane %v301_v24, 6  ;;  %v306_v29 = vrot.slane %v304_v25, 7  ;;  %699 = vmatpush.bf16.msrb.mxu0 %v989_v21 }
  0x1a   : > { %v254_v31 = vrot.slane %v252_v26, 7 }
  0x1b   : > { %v307_v35 = vor.u32 %v306_v29, %v303_v28 }
  0x1c   : > { %v257_v39 = vor.u32 %v255_v27, %v254_v31  ;;  %v258_v40 = vrot.slane %v254_v31, 4  ;;  %v988_v27 = vld [vmem:[%s1231_s3 + $0x8] sm:$0xff]  ;;  %v987_v31 = vld [vmem:[%s1231_s3] sm:$0xff] }
  0x1d   : > { %v308_v41 = vrot.slane %v307_v35, 4  ;;  %v315_v43 = vsel %vm1117_vm9, %v307_v35, %v314_v34  ;;  %700 = vmatpush.bf16.msrb.mxu0 %v988_v27  ;;  %vm509_vm9 = vsmask.f32 4368 }
  0x1e   : > { %v265_v44 = vsel %vm263_vm10, %v257_v39, %v264_v37  ;;  %v271_v45 = vsel %vm1112_vm8, %v258_v40, %v270_v32  ;;  %316 = vst [vmem:[#allocation2 + $0x4] sm:$0xe] %v315_v43  ;;  %v541_v40 = vld [vmem:[#allocation3] sm:$0xf]  ;;  %vm551_vm10 = vcmask 516096  }
  0x1f   : > { %v321_v46 = vsel %vm319_vm11, %v308_v41, %v320_v38  ;;  %266 = vst [vmem:[#allocation2] sm:$0xf] %v265_v44  ;;  %v994_v41 = vld [vmem:[%s1231_s3 + $0x38] sm:$0xff]  ;;  %v997_v44 = vld [vmem:[%s1231_s3 + $0x50] sm:$0xff]  ;;  %vm1183_vm11 = vmor %vm268_vm1, %vm509_vm9 }
  0x20   : > { %322 = vst [vmem:[#allocation2 + $0x8] sm:$0x3] %v321_v46  ;;  %648 = vmatpush.bf16.msrb.mxu3 %v994_v41  ;;  %763 = vmatpush.bf16.msrb.mxu1 %v997_v44  ;;  %vm552_vm12 = vmand %vm551_vm10, %vm268_vm1  ;;  %vm546_vm1 = vcmask 517120  }
  0x21   : > { %272 = vst [vmem:[#allocation2 + $0x4] sm:$0x1] %v271_v45  ;;  %701 = vmatpush.bf16.msrb.mxu0 %v987_v31  ;;  %v993_v45 = vld [vmem:[%s1231_s3 + $0x30] sm:$0xff] }
  0x24   : > { %649 = vmatpush.bf16.msrb.mxu3 %v993_v45 }
  0x25   : > { %v325_v47 = vld [vmem:[#allocation2 + $0x4] sm:$0x2] }
  0x26   : > { %v326_v48 = vsel %vm324_vm13, 0, %v325_v47  ;;  %v273_v49 = vld [vmem:[#allocation2] sm:$0x1]  ;;  %v1027_v8 = vld [vmem:[#allocation2] sm:$0xe]  ;;  %vm560_vm13 = vcmask 517121  }
  0x27   : > { %v329_v50 = vld [vmem:[#allocation2 + $0x8] sm:$0x2]  ;;  %v334_v51 = vld [vmem:[#allocation2 + $0x8] sm:$0x1]  ;;  %327 = vst [vmem:[#allocation2 + $0x4] sm:$0x2] %v326_v48 }
  0x28   : > { %v330_v52 = vsel %vm328_vm14, 0, %v329_v50  ;;  %v407_v53 = vunpack.c.l.b16 %v334_v51  ;;  %v277_v54 = vld [vmem:[#allocation2 + $0x4] sm:$0x1]  ;;  %v274_v55 = vsel %vm1112_vm8, 0, %v273_v49  ;;  %vm540_vm8 = vmand %vm539_vm6, %vm262_vm5  ;;  %v996_v50 = vld [vmem:[%s1231_s3 + $0x48] sm:$0xff] }
  0x29   : > { %331 = vst [vmem:[#allocation2 + $0x8] sm:$0x2] %v330_v52  ;;  %v278_v56 = vsel %vm276_vm15, 0, %v277_v54  ;;  %764 = vmatpush.bf16.msrb.mxu1 %v996_v50  ;;  %vm556_vm14 = vmand %vm551_vm10, %vm262_vm5  ;;  %vm637_vm5 = vcmask 523264  }
  0x2a   : > { %v408_v57 = vpack.c.b16 %v407_v53, %v407_v53  ;;  %279 = vst [vmem:[#allocation2 + $0x4] sm:$0x1] %v278_v56  ;;  %v992_v53 = vld [vmem:[%s1231_s3 + $0x28] sm:$0xff]  ;;  %vm561_vm15 = vmand %vm560_vm13, %vm318_vm7 }
  0x2b   : > { %275 = vst [vmem:[#allocation2] sm:$0x1] %v274_v55  ;;  %650 = vmatpush.bf16.msrb.mxu3 %v992_v53 }
  0x2c   : > { %891 = vmatmul.msk.bf16.vlgmr.msra.gmra.mxu3 %vm381_vm3, %v408_v57 }
  0x30   : > { %v339_v58 = vld [vmem:[#allocation2 + $0x8] sm:$0x3] }
  0x31   : > { %v350_v59 = vunpack.c.l.b16 %v339_v58  ;;  %v1026_v7 = vld [vmem:[#allocation2] sm:$0xf0] }
  0x32   : > { %v1016_v60 = vld [vmem:[#allocation2] sm:$0xff]   ;;  %v1028_v9 = vor.u32 %v1027_v8, %v1026_v7 }
  0x33   : > { %v352_v61 = vpack.c.b16 %v350_v59, %v350_v59  ;;  %v355_v62 = vshrl.u32 %v1016_v60, 16  ;;  %v357_v63 = vshll.u32 %v1016_v60, 16  ;;  %890 = vmatmul.msk.bf16.vlgmr.msra.gmra.mxu1 %vm381_vm3, %v1016_v60  ;;  %v995_v58 = vld [vmem:[%s1231_s3 + $0x40] sm:$0xff] }
  0x34   : > { %v454_v10 = vrot.slane %v1028_v9, 1  ;;  %765 = vmatpush.bf16.msrb.mxu1 %v995_v58  ;;  %v548_v9 = vld [vmem:[#allocation3 + $0x8] sm:$0x3] }
  0x35   : > { %v362_v0 = vshll.u32 %v352_v61, 16  ;;  %v366_v1 = vshrl.u32 %v352_v61, 16  ;;  %v359_v2 = vrot.slane %v357_v63, 1  ;;  %v455_v11 = vrot.slane %v352_v61, 1 }
  0x37   : > { %v364_v3 = vrot.slane %v362_v0, 1  ;;  %v360_v4 = vor.u32 %v359_v2, %v355_v62  ;;  %v456_v12 = vsel %vm453_vm4, %v454_v10, %v455_v11  ;;  %v991_v62 = vld [vmem:[%s1231_s3 + $0x20] sm:$0xff] }
  0x38   : > { %651 = vmatpush.bf16.msrb.mxu3 %v991_v62 }
  0x39   : > { %v368_v5 = vor.u32 %v366_v1, %v364_v3  ;;  %v365_v6 = vsel %vm353_vm0, %v360_v4, %v364_v3 }
  0x3a   : > { %880 = vmatmul.msk.bf16.vlgmr.msra.gmra.mxu0 %vm381_vm3, %v365_v6 }
  0x3b   : > { %881 = vmatmul.msk.bf16.vlgmr.msra.gmra.mxu2 %vm381_vm3, %v368_v5 }
  0x4b   : > { %904 = vmatmul.msk.bf16.vlgmr.msrb.gmra.mxu2 %vm381_vm3, %v456_v12 }
  0x5b   : > { %905 = vmatmul.msk.bf16.gmra.mxu2 %vm381_vm3, %v455_v11  ;;  %vm547_vm3 = vmand %vm546_vm1, %vm318_vm7 }
  0xaf   : > { %v440_v13 = vpop.f32.mrf.mxu3 }
  0xb0   : > { %v435_v16 = vpop.f32.mrf.mxu1 }
  0xb7   : > { %v442_v14 = vpop.f32.mrf.mxu3  ;;  %v397_v18 = vpop.f32.mrf.mxu0 }
  0xb8   : > { %v436_v20 = vadd.f32 %v435_v16, %v397_v18  ;;  %v437_v26 = vpop.f32.mrf.mxu1 }
  0xbe   : > { %v402_v15 = vpop.f32.mrf.mxu2 }
  0xbf   : > { %v399_v25 = vpop.f32.mrf.mxu0  ;;  %v441_v46 = vadd.f32 %v440_v13, %v402_v15 }
  0xc0   : > { %v438_v30 = vadd.f32 %v437_v26, %v399_v25 }
  0xc6   : > { %v404_v17 = vpop.f32.mrf.mxu2 }
  0xce   : > { %v484_v23 = vpop.f32.mrf.mxu2 }
  0xcf   : > { %v493_v24 = vadd.f32 %v484_v23, %v436_v20 }
  0xd1   : > { %v500_v28 = vadd.f32 %v1044_v22, %v493_v24 }
  0xd3   : > { %v503_v29 = vmax.f32 %v500_v28, 0.0 }
  0xd5   : > { %v506_v32 = vpack.c.bf16 %v503_v29, %v503_v29 }
  0xd6   : > { %v486_v33 = vpop.f32.mrf.mxu2 }
  0xd7   : > { %v512_v34 = vshrl.u32 %v506_v32, 16  ;;  %v494_v35 = vadd.f32 %v486_v33, %v438_v30  ;;  %v515_v38 = vshll.u32 %v506_v32, 16 }
  0xd9   : > { %v514_v37 = vrot.slane %v512_v34, 7  ;;  %v501_v39 = vadd.f32 %v1044_v22, %v494_v35 }
  0xdb   : > { %v517_v42 = vor.u32 %v515_v38, %v514_v37  ;;  %v504_v43 = vmax.f32 %v501_v39, 0.0  ;;  %v518_v59 = vrot.slane %v514_v37, 4 }
  0xdd   : > { %v542_v47 = vsel %vm540_vm8, %v517_v42, %v541_v40  ;;  %v507_v48 = vpack.c.bf16 %v504_v43, %v504_v43 }
  0xde   : > { %543 = vst [vmem:[#allocation3] sm:$0xf] %v542_v47  ;;  %v489_v49 = vpop.f32.mrf.mxu2 }
  0xdf   : > { %v520_v51 = vshrl.u32 %v507_v48, 16  ;;  %v495_v52 = vadd.f32 %v489_v49, %v441_v46  ;;  %v523_v55 = vshll.u32 %v507_v48, 16  ;;  %v1045_v48 = vld [vmem:[%s1232_s4] ss:$0 sm:$0xff] }
  0xe1   : > { %v522_v54 = vrot.slane %v520_v51, 7  ;;  %v502_v56 = vadd.f32 %v1044_v22, %v495_v52 }
  0xe3   : > { %v525_v60 = vor.u32 %v523_v55, %v522_v54  ;;  %v505_v61 = vmax.f32 %v502_v56, 0.0  ;;  %v527_v7 = vrot.slane %v522_v54, 4 }
  0xe5   : > { %v553_v63 = vld [vmem:[#allocation3] sm:$0x1]  ;;  %v526_v0 = vsel %vm1183_vm11, %v518_v59, %v525_v60  ;;  %v508_v1 = vpack.c.bf16 %v505_v61, %v505_v61  ;;  %v1030_v23 = vld [vmem:[#allocation3] sm:$0xe] }
  0xe6   : > { %v554_v2 = vsel %vm552_vm12, 0, %v553_v63  ;;  %545 = vst.msk [vmem:[#allocation3 + $0x4] sm:$0xf] %vm539_vm6, %v526_v0  ;;  %v491_v3 = vpop.f32.mrf.mxu2  ;;  %vm565_vm6 = vmand %vm560_vm13, %vm312_vm2  ;;  %vm791_vm2 = vcmask 523266  }
  0xe7   : > { %555 = vst [vmem:[#allocation3] sm:$0x1] %v554_v2  ;;  %v529_v4 = vshrl.u32 %v508_v1, 16  ;;  %v532_v6 = vshll.u32 %v508_v1, 16 }
  0xe9   : > { %v531_v5 = vrot.slane %v529_v4, 7 }
  0xeb   : > { %v534_v8 = vor.u32 %v532_v6, %v531_v5 }
  0xed   : > { %v557_v10 = vld [vmem:[#allocation3 + $0x4] sm:$0x1]  ;;  %v562_v11 = vld [vmem:[#allocation3 + $0x4] sm:$0x2]  ;;  %v535_v12 = vsel %vm1183_vm11, %v527_v7, %v534_v8 }
  0xee   : > { %v558_v13 = vsel %vm556_vm14, 0, %v557_v10  ;;  %v563_v14 = vsel %vm561_vm15, 0, %v562_v11  ;;  %v549_v15 = vsel %vm547_vm3, %v535_v12, %v548_v9 }
  0xef   : > { %559 = vst [vmem:[#allocation3 + $0x4] sm:$0x1] %v558_v13 }
  0xf0   : > { %564 = vst [vmem:[#allocation3 + $0x4] sm:$0x2] %v563_v14 }
  0xf1   : > { %550 = vst [vmem:[#allocation3 + $0x8] sm:$0x3] %v549_v15 }
  0xf7   : > { %v1020_v16 = vld [vmem:[#allocation3] sm:$0xff]  }
  0xf8   : > { %v566_v17 = vld [vmem:[#allocation3 + $0x8] sm:$0x2]  ;;  %948 = vmatmul.msk.bf16.vlgmr.msrb.gmra.mxu0 %vm637_vm5, %v1020_v16  ;;  %v571_v19 = vld [vmem:[#allocation3 + $0x8] sm:$0x1]  ;;  %v1029_v20 = vld [vmem:[#allocation3] sm:$0xf0] }
  0xf9   : > { %v567_v18 = vsel %vm565_vm6, 0, %v566_v17  ;;  %v601_v21 = vshll.u32 %v1020_v16, 16  ;;  %v663_v24 = vunpack.c.l.b16 %v571_v19  ;;  %v1031_v26 = vor.u32 %v1030_v23, %v1029_v20 }
  0xfa   : > { %568 = vst [vmem:[#allocation3 + $0x8] sm:$0x2] %v567_v18  ;;  %v599_v29 = vshrl.u32 %v1020_v16, 16 }
  0xfb   : > { %v603_v27 = vrot.slane %v601_v21, 1  ;;  %v664_v30 = vpack.c.b16 %v663_v24, %v663_v24  ;;  %v725_v31 = vrot.slane %v1031_v26, 1 }
  0xfd   : > { %v604_v34 = vor.u32 %v603_v27, %v599_v29 }
 0x101   : > { %v580_v22 = vld [vmem:[#allocation3 + $0x8] sm:$0x3] }
 0x102   : > { %v595_v25 = vunpack.c.l.b16 %v580_v22 }
 0x104   : > { %v597_v28 = vpack.c.b16 %v595_v25, %v595_v25 }
 0x106   : > { %v726_v32 = vrot.slane %v597_v28, 1  ;;  %v606_v33 = vshll.u32 %v597_v28, 16  ;;  %v610_v38 = vshrl.u32 %v597_v28, 16 }
 0x108   : > { %949 = vmatmul.msk.bf16.gmra.mxu0 %vm637_vm5, %v664_v30  ;;  %v727_v35 = vsel %vm453_vm4, %v725_v31, %v726_v32  ;;  %v608_v36 = vrot.slane %v606_v33, 1 }
 0x109   : > { %974 = vmatmul.msk.bf16.vlgmr.msrb.gmra.mxu1 %vm637_vm5, %v727_v35 }
 0x10a   : > { %v609_v37 = vsel %vm353_vm0, %v604_v34, %v608_v36  ;;  %v612_v39 = vor.u32 %v610_v38, %v608_v36 }
 0x10b   : > { %930 = vmatmul.msk.bf16.vlgmr.msrb.gmra.mxu3 %vm637_vm5, %v609_v37 }
 0x119   : > { %975 = vmatmul.msk.bf16.gmra.mxu1 %vm637_vm5, %v726_v32 }
 0x11b   : > { %931 = vmatmul.msk.bf16.gmra.mxu3 %vm637_vm5, %v612_v39 }
 0x175   : > { %v703_v40 = vpop.f32.mrf.mxu0 }
 0x17d   : > { %v705_v41 = vpop.f32.mrf.mxu0 }
 0x185   : > { %v708_v42 = vpop.f32.mrf.mxu0 }
 0x186   : > { %v767_v43 = vpop.f32.mrf.mxu1 }
 0x18d   : > { %v710_v44 = vpop.f32.mrf.mxu0 }
 0x18e   : > { %v653_v45 = vpop.f32.mrf.mxu3  ;;  %v769_v46 = vpop.f32.mrf.mxu1 }
 0x18f   : > { %v704_v47 = vadd.f32 %v703_v40, %v653_v45 }
 0x191   : > { %v776_v49 = vadd.f32 %v767_v43, %v704_v47 }
 0x193   : > { %v783_v50 = vadd.f32 %v1045_v48, %v776_v49 }
 0x195   : > { %v786_v51 = vmax.f32 %v783_v50, 0.0 }
 0x196   : > { %v655_v52 = vpop.f32.mrf.mxu3  ;;  %v772_v53 = vpop.f32.mrf.mxu1 }
 0x197   : > { %789 = vst.msk [vmem:[%s229_s21] sm:$0xff] %vm637_vm5, %v786_v51  ;;  %v706_v54 = vadd.f32 %v705_v41, %v655_v52 }
 0x199   : > { %v777_v55 = vadd.f32 %v769_v46, %v706_v54 }
 0x19b   : > { %v784_v56 = vadd.f32 %v1045_v48, %v777_v55 }
 0x19d   : > { %v787_v57 = vmax.f32 %v784_v56, 0.0 }
 0x19e   : > { %v658_v58 = vpop.f32.mrf.mxu3  ;;  %v774_v59 = vpop.f32.mrf.mxu1 }
 0x19f   : > { %976 = vst.msk [vmem:[%s229_s21 + $0x6] sm:$0xfc] %vm791_vm2, %v787_v57  ;;  %v709_v60 = vadd.f32 %v708_v42, %v658_v58 }
 0x1a1   : > { %v778_v61 = vadd.f32 %v772_v53, %v709_v60 }
 0x1a3   : > { %v785_v62 = vadd.f32 %v1045_v48, %v778_v61 }
 0x1a5   : > { %v788_v63 = vmax.f32 %v785_v62, 0.0 }
 0x1a6   : > { %v660_v0 = vpop.f32.mrf.mxu3 }
 0x1a7   : > { %977 = vst.msk [vmem:[%s229_s21 + $0xe] sm:$0x3] %vm546_vm1, %v788_v63 }
 0x1a8 PF: > { %s15_s18 = sadd.s32 1, %s1052_s18  }
 0x1a9   : > { %p12_p4 = scmp.ge.s32.totalorder %s15_s18, 4  }
 0x1ab   :  { %14 = sbr.rel (!%p12_p4) target bundleno = 1 (0x1), region = 82 }

</bundles_post_ra>
